<compile_context>
chip_gen: v6e
topology: v6e:2x2x1
jax: 0.10.0
libtpu: 0.0.40
codegen_flags: <defaults>
</compile_context>

<pallas_src>
import jax
import jax.numpy as jnp
from jax.experimental import pallas as pl
from jax.experimental.pallas import tpu as pltpu


def _round_up(x, m):
    return ((x + m - 1) // m) * m


def _fusion_kernel(low_ref, high_ref, wblk_ref, wht_ref, b_ref, alpha_ref, o_ref):
    # low_ref : (TB, N*C_low)       high_ref : (TB, C_high)
    # wblk_ref: (N*C_low, N*C_out)  wht_ref  : (C_high, N*C_out)
    # b_ref   : (1, N*C_out)        alpha_ref: (1,) f32 in SMEM
    acc = jnp.dot(low_ref[...], wblk_ref[...], preferred_element_type=jnp.float32)
    acc = acc + jnp.dot(high_ref[...], wht_ref[...],
                        preferred_element_type=jnp.float32)
    acc = acc + b_ref[...]                       # (1, N*C_out) -> (TB, N*C_out)
    alpha = alpha_ref[0]
    o_ref[...] = jnp.where(acc > 0, acc, alpha * acc).astype(o_ref.dtype)


def feature_fusion(low_level_feat, high_level_feat, weight, bias, alpha,
                   *, tb=1024):
    """Pallas implementation of FeatureFusion.forward.

    low_level_feat : (B, T, M, N, C_low)
    high_level_feat: (B, T, M, C_high)
    weight         : (C_out, C_low + C_high)   (PyTorch nn.Linear layout)
    bias           : (C_out,)
    alpha          : scalar (PReLU single parameter)
    tb             : base-row tile (rows of B*T*M per grid step)
    returns        : (B, T, M, N, C_out)
    """
    B, T, M, N, C_low = low_level_feat.shape
    C_high = high_level_feat.shape[-1]
    C_out = weight.shape[0]
    out_dtype = low_level_feat.dtype

    # ---- fold expand + concat + Linear into two matmuls (built once, tiny) --
    w_low = weight[:, :C_low].T.astype(jnp.float32)     # (C_low, C_out)
    w_high = weight[:, C_low:].T.astype(jnp.float32)    # (C_high, C_out)
    eye_n = jnp.eye(N, dtype=jnp.float32)
    # Block-diagonal: N copies of w_low -> (N*C_low, N*C_out)
    w_blk = jnp.einsum('ij,kl->ikjl', eye_n, w_low).reshape(N * C_low, N * C_out)
    # High projection replicated across the N output blocks (lane-tiled).
    w_high_tiled = jnp.tile(w_high, (1, N))              # (C_high, N*C_out)
    bias_tiled = jnp.tile(bias.astype(jnp.float32), N).reshape(1, N * C_out)
    alpha_arr = jnp.asarray(alpha, jnp.float32).reshape(1)

    # ---- lane-dense row packing (free views of contiguous layouts) ----------
    RB = B * T * M
    low_packed = low_level_feat.reshape(RB, N * C_low)
    high_flat = high_level_feat.reshape(RB, C_high)

    # ---- tiling: large base-row tiles, zero-padded tail ---------------------
    tb_eff = max(8, min(_round_up(tb, 8), _round_up(RB, 8)))
    RB_pad = _round_up(RB, tb_eff)
    if RB_pad != RB:
        pad = RB_pad - RB
        low_packed = jnp.pad(low_packed, ((0, pad), (0, 0)))
        high_flat = jnp.pad(high_flat, ((0, pad), (0, 0)))
    grid = (RB_pad // tb_eff,)

    out_packed = pl.pallas_call(
        _fusion_kernel,
        out_shape=jax.ShapeDtypeStruct((RB_pad, N * C_out), out_dtype),
        grid_spec=pltpu.PrefetchScalarGridSpec(
            num_scalar_prefetch=0,
            grid=grid,
            in_specs=[
                pl.BlockSpec((tb_eff, N * C_low), lambda i: (i, 0)),
                pl.BlockSpec((tb_eff, C_high), lambda i: (i, 0)),
                pl.BlockSpec((N * C_low, N * C_out), lambda i: (0, 0)),
                pl.BlockSpec((C_high, N * C_out), lambda i: (0, 0)),
                pl.BlockSpec((1, N * C_out), lambda i: (0, 0)),
                pl.BlockSpec(memory_space=pltpu.MemorySpace.SMEM),
            ],
            out_specs=pl.BlockSpec((tb_eff, N * C_out), lambda i: (i, 0)),
        ),
        compiler_params=pltpu.CompilerParams(
            dimension_semantics=("parallel",)),
    )(low_packed, high_flat, w_blk, w_high_tiled, bias_tiled, alpha_arr)

    return out_packed[:RB].reshape(B, T, M, N, C_out)


def _reference(low, high, weight, bias, alpha):
    B, T, M, N, C_low = low.shape
    high_e = jnp.broadcast_to(high[:, :, :, None, :],
                              (B, T, M, N, high.shape[-1]))
    fused = jnp.concatenate([low, high_e], axis=-1)
    y = fused @ weight.T + bias
    return jnp.where(y > 0, y, alpha * y)


def _run_case(key, B, T, M, N, C_low, C_high, C_out, tb=1024):
    k1, k2, k3, k4 = jax.random.split(key, 4)
    low = jax.random.normal(k1, (B, T, M, N, C_low), dtype=jnp.float32)
    high = jax.random.normal(k2, (B, T, M, C_high), dtype=jnp.float32)
    weight = jax.random.normal(k3, (C_out, C_low + C_high),
                               dtype=jnp.float32) * 0.1
    bias = jax.random.normal(k4, (C_out,), dtype=jnp.float32) * 0.1
    alpha = 0.25  # nn.PReLU default init

    out = feature_fusion(low, high, weight, bias, alpha, tb=tb)
    out = jax.block_until_ready(out)
    ref = _reference(low, high, weight, bias, alpha)
    assert out.shape == (B, T, M, N, C_out)
    assert jnp.allclose(out, ref, atol=1e-5, rtol=1e-5)


if __name__ == "__main__":
    key = jax.random.PRNGKey(0)
    ka, kb = jax.random.split(key)

    # Lane-aligned demo shapes (N*C_low = 128, N*C_out = 256).
    _run_case(ka, B=2, T=2, M=4, N=8, C_low=16, C_high=16, C_out=32)

    # Ragged shapes: exercises the zero-padded tail and non-128 lane widths.
    _run_case(kb, B=1, T=3, M=3, N=4, C_low=8, C_high=12, C_out=20, tb=8)

    print("KERNEL_OK")
</pallas_src>

<mosaic_0001>
module attributes {stable_mosaic.version = 11 : i64} {
  func.func @_fusion_kernel(%arg0: i32, %arg1: memref<16x128xf32, #tpu.memory_space<vmem>>, %arg2: memref<16x16xf32, #tpu.memory_space<vmem>>, %arg3: memref<128x256xf32, #tpu.memory_space<vmem>>, %arg4: memref<16x256xf32, #tpu.memory_space<vmem>>, %arg5: memref<1x256xf32, #tpu.memory_space<vmem>>, %arg6: memref<1xf32, #tpu.memory_space<smem>>, %arg7: memref<16x256xf32, #tpu.memory_space<vmem>>) attributes {dimension_semantics = [#tpu.dimension_semantics<parallel>], iteration_bounds = array<i64: 1>, scalar_prefetch = 0 : i64, scratch_operands = 0 : i64, tpu.core_type = #tpu.core_type<tc>, window_params = [{transform_indices = @transform_0, window_bounds = array<i64: 16, 128>}, {transform_indices = @transform_1, window_bounds = array<i64: 16, 16>}, {pipeline_mode = #tpu.pipeline_mode<synchronous>, transform_indices = @transform_2, window_bounds = array<i64: 128, 256>}, {pipeline_mode = #tpu.pipeline_mode<synchronous>, transform_indices = @transform_3, window_bounds = array<i64: 16, 256>}, {pipeline_mode = #tpu.pipeline_mode<synchronous>, transform_indices = @transform_4, window_bounds = array<i64: 1, 256>}, {transform_indices = @transform_5, window_bounds = array<i64: 1>}, {transform_indices = @transform_6, window_bounds = array<i64: 16, 256>}]} {
    %c0 = arith.constant 0 : index
    %c0_0 = arith.constant 0 : index
    %0 = vector.load %arg1[%c0, %c0_0] : memref<16x128xf32, #tpu.memory_space<vmem>>, vector<16x128xf32>
    %c0_1 = arith.constant 0 : index
    %c0_2 = arith.constant 0 : index
    %1 = vector.load %arg3[%c0_1, %c0_2] : memref<128x256xf32, #tpu.memory_space<vmem>>, vector<128x256xf32>
    %cst = arith.constant dense<0.000000e+00> : vector<16x256xf32>
    %2 = tpu.matmul %0, %1, %cst {dimension_numbers = #tpu.dot_dimension_numbers<[1], [0], [0], [1], [0, 0, 1, 1], [], []>} : vector<16x128xf32>, vector<128x256xf32>, vector<16x256xf32> -> vector<16x256xf32>
    %c0_3 = arith.constant 0 : index
    %c0_4 = arith.constant 0 : index
    %3 = vector.load %arg2[%c0_3, %c0_4] : memref<16x16xf32, #tpu.memory_space<vmem>>, vector<16x16xf32>
    %c0_5 = arith.constant 0 : index
    %c0_6 = arith.constant 0 : index
    %4 = vector.load %arg4[%c0_5, %c0_6] : memref<16x256xf32, #tpu.memory_space<vmem>>, vector<16x256xf32>
    %cst_7 = arith.constant dense<0.000000e+00> : vector<16x256xf32>
    %5 = tpu.matmul %3, %4, %cst_7 {dimension_numbers = #tpu.dot_dimension_numbers<[1], [0], [0], [1], [0, 0, 1, 1], [], []>} : vector<16x16xf32>, vector<16x256xf32>, vector<16x256xf32> -> vector<16x256xf32>
    %6 = arith.addf %2, %5 : vector<16x256xf32>
    %c0_8 = arith.constant 0 : index
    %c0_9 = arith.constant 0 : index
    %7 = vector.load %arg5[%c0_8, %c0_9] : memref<1x256xf32, #tpu.memory_space<vmem>>, vector<1x256xf32>
    %8 = vector.broadcast %7 : vector<1x256xf32> to vector<16x256xf32>
    %9 = arith.addf %6, %8 : vector<16x256xf32>
    %c0_10 = arith.constant 0 : index
    %10 = memref.load %arg6[%c0_10] : memref<1xf32, #tpu.memory_space<smem>>
    %cst_11 = arith.constant 0.000000e+00 : f32
    %11 = vector.broadcast %cst_11 : f32 to vector<16x256xf32>
    %12 = arith.cmpf ogt, %9, %11 : vector<16x256xf32>
    %13 = vector.broadcast %10 : f32 to vector<16x256xf32>
    %14 = arith.mulf %13, %9 : vector<16x256xf32>
    %15 = arith.select %12, %9, %14 : vector<16x256xi1>, vector<16x256xf32>
    %c0_12 = arith.constant 0 : index
    %c0_13 = arith.constant 0 : index
    %16 = vector.load %arg7[%c0_12, %c0_13] : memref<16x256xf32, #tpu.memory_space<vmem>>, vector<16x256xf32>
    tpu.vector_store %arg7[%c0_12, %c0_13], %15 {strides = array<i32>} : memref<16x256xf32, #tpu.memory_space<vmem>>, vector<16x256xf32>,
    return
  }
  func.func @transform_0(%arg0: i32) -> (i32, i32) {
    %c0_i32 = arith.constant 0 : i32
    %c0_i32_0 = arith.constant 0 : i32
    return %arg0, %c0_i32 : i32, i32
  }
  func.func @transform_1(%arg0: i32) -> (i32, i32) {
    %c0_i32 = arith.constant 0 : i32
    %c0_i32_0 = arith.constant 0 : i32
    return %arg0, %c0_i32 : i32, i32
  }
  func.func @transform_2(%arg0: i32) -> (i32, i32) {
    %c0_i32 = arith.constant 0 : i32
    %c0_i32_0 = arith.constant 0 : i32
    %c0_i32_1 = arith.constant 0 : i32
    return %c0_i32, %c0_i32_0 : i32, i32
  }
  func.func @transform_3(%arg0: i32) -> (i32, i32) {
    %c0_i32 = arith.constant 0 : i32
    %c0_i32_0 = arith.constant 0 : i32
    %c0_i32_1 = arith.constant 0 : i32
    return %c0_i32, %c0_i32_0 : i32, i32
  }
  func.func @transform_4(%arg0: i32) -> (i32, i32) {
    %c0_i32 = arith.constant 0 : i32
    %c0_i32_0 = arith.constant 0 : i32
    %c0_i32_1 = arith.constant 0 : i32
    return %c0_i32, %c0_i32_0 : i32, i32
  }
  func.func @transform_5(%arg0: i32) -> i32 {
    %c0_i32 = arith.constant 0 : i32
    %c0_i32_0 = arith.constant 0 : i32
    return %c0_i32 : i32
  }
  func.func @transform_6(%arg0: i32) -> (i32, i32) {
    %c0_i32 = arith.constant 0 : i32
    %c0_i32_0 = arith.constant 0 : i32
    return %arg0, %c0_i32 : i32, i32
  }
}

</mosaic_0001>

<bundles_post_ra>
// kernel: tpu_custom_call.1
= control target key start
LH: loop header
LB: loop body
LE: loop exit
PB: predicated region body
PF: predicated region fallthrough
CT: control target
= control target key end

     0   :  { %12 = vsyncpa [#allocation4], 0  ;;  %s535_s0 = inlined_call_operand.hbm [shape: f32[16,128], index: 0, kind: input, shape index: {}]   ;;  %s536_s1 = inlined_call_operand.hbm [shape: f32[16,16], index: 1, kind: input, shape index: {}]   ;;  %s537_s2 = inlined_call_operand.hbm [shape: f32[128,256], index: 2, kind: input, shape index: {}]   ;;  %s538_s3 = inlined_call_operand.hbm [shape: f32[16,256], index: 3, kind: input, shape index: {}]   ;;  %s539_s4 = inlined_call_operand.vmem [shape: f32[1,256], index: 4, kind: input, shape index: {}]   ;;  %s540_s5 = inlined_call_operand.<no memory space> [shape: f32[1], index: 5, kind: input, shape index: {}]   ;;  %s541_s6 = inlined_call_operand.hbm [shape: f32[16,256], index: 6, kind: output, shape index: {}]  }
   0x1   :  { %13 = vsyncpa [#allocation7], 0 }
   0x2   :  { %14 = vsyncpa [#allocation10], 0 }
   0x3   :  { %15 = vsyncpa [#allocation5], 0  ;;  %s454_s21 = smov [#allocation6]   ;;  %s455_s23 = smov [#allocation3]  }
   0x4   :  { %s33_s22 = sshll.u32 %s454_s21, 4  ;;  %s21_s24 = sshll.u32 %s455_s23, 4  ;;  %s34_s22 = int_to_ptr.vmem [resolvable:$true] %s33_s22  ;;  %s22_s24 = int_to_ptr.vmem [resolvable:$true] %s21_s24 }
   0x5   :  { %s354_s25 = scalar_lea.vmem %s34_s22, 256  ;;  %p359_p1 = scmp.lt.s32.totalorder %s34_s22, %s34_s22 }
   0x6   :  { %p355_p0 = scmp.ne.s32.totalorder %s34_s22, %s354_s25  ;;  %p360_p2 = scmp.lt.s32.totalorder %s354_s25, %s354_s25 }
   0x8   :  { %p361_p3 = por %p360_p2, %p359_p1 }
   0xa   :  { %p362_p4 = pnand %p361_p3, %p355_p0 }
   0xc   :  { %365 = shalt.err (!%p362_p4)
}
   0xd   :  { %s456_s26 = smov 128   ;;  %s457_s27 = smov 8  }
   0xe   :  { %39 = dma.hbm_to_vmem [thread:$0]  %s536_s1, 256, %s34_s22, [#allocation7], %s456_s26, %s456_s26, %s457_s27  }
   0xf   :  { %s374_s30 = scalar_lea.vmem %s22_s24, 256  ;;  %p379_p6 = scmp.lt.s32.totalorder %s22_s24, %s22_s24 }
  0x10   :  { %p375_p5 = scmp.ne.s32.totalorder %s22_s24, %s374_s30  ;;  %p380_p7 = scmp.lt.s32.totalorder %s374_s30, %s374_s30 }
  0x12   :  { %p381_p8 = por %p380_p7, %p379_p6 }
  0x14   :  { %p382_p9 = pnand %p381_p8, %p375_p5 }
  0x16   :  { %385 = shalt.err (!%p382_p9)
}
  0x17   :  { %27 = dma.hbm_to_vmem [thread:$0]  %s535_s0, 256, %s22_s24, [#allocation4], %s456_s26, %s456_s26, %s457_s27  }
  0x18   :  { %s458_s9 = smov [#allocation8]  }
  0x19   :  { %s45_s10 = sshll.u32 %s458_s9, 4  ;;  %s46_s10 = int_to_ptr.vmem [resolvable:$true] %s45_s10 }
  0x1a   :  { %s394_s11 = scalar_lea.vmem %s46_s10, 4096  ;;  %p399_p11 = scmp.lt.s32.totalorder %s46_s10, %s46_s10 }
  0x1b   :  { %p395_p10 = scmp.ne.s32.totalorder %s46_s10, %s394_s11  ;;  %p400_p12 = scmp.lt.s32.totalorder %s394_s11, %s394_s11 }
  0x1d   :  { %p401_p13 = por %p400_p12, %p399_p11 }
  0x1f   :  { %p402_p0 = pnand %p401_p13, %p395_p10 }
  0x21   :  { %405 = shalt.err (!%p402_p0)
}
  0x22   :  { %s459_s1 = smov 256   ;;  %s460_s12 = smov 16  }
  0x23   :  { %51 = dma.hbm_to_vmem [thread:$0]  %s537_s2, 4096, %s46_s10, [#allocation7], %s459_s1, %s459_s1, %s460_s12  }
  0x24   :  { %s461_s0 = smov [#allocation9]  }
  0x25   :  { %s57_s15 = sshll.u32 %s461_s0, 4  ;;  %s58_s15 = int_to_ptr.vmem [resolvable:$true] %s57_s15 }
  0x26   :  { %s414_s16 = scalar_lea.vmem %s58_s15, 512  ;;  %p419_p2 = scmp.lt.s32.totalorder %s58_s15, %s58_s15 }
  0x27   :  { %p415_p1 = scmp.ne.s32.totalorder %s58_s15, %s414_s16  ;;  %p420_p3 = scmp.lt.s32.totalorder %s414_s16, %s414_s16 }
  0x29   :  { %p421_p4 = por %p420_p3, %p419_p2 }
  0x2b   :  { %p422_p5 = pnand %p421_p4, %p415_p1 }
  0x2d   :  { %425 = shalt.err (!%p422_p5)
}
  0x2e   :  { %63 = dma.hbm_to_vmem [thread:$0]  %s538_s3, 512, %s58_s15, [#allocation10], %s459_s1, %s459_s1, %s460_s12  }
  0x2f   :  { %446 = dma.done.wait [#allocation4], 256  }
  0x30   :  { %447 = vsyncadd [#allocation4], 4294967040 }
  0x31   :  { %448 = dma.done.wait [#allocation7], 4352  }
  0x32   :  { %449 = vsyncadd [#allocation7], 4294962944 }
  0x33   :  { %450 = dma.done.wait [#allocation10], 512  }
  0x34   :  { %451 = vsyncadd [#allocation10], 4294966784  ;;  %v462_v0 = vmov 0.0   ;;  %v113_v1 = vld [vmem:[#allocation8 + $0xf8] sm:$0xff]  ;;  %v112_v2 = vld [vmem:[#allocation8 + $0xf0] sm:$0xff]  ;;  %vm120_vm0 = vcmask 130048   ;;  %v283_v41 = vlaneseq  ;;  %v302_v52 = vstv %s540_s5 }
  0x35   :  { %191 = vmatprep.mubr.f32.mxu0 %v462_v0  ;;  %268 = vmatprep.mubr.f32.mxu1 %v462_v0  ;;  %v111_v3 = vld [vmem:[#allocation8 + $0xe8] sm:$0xff]  ;;  %v110_v4 = vld [vmem:[#allocation8 + $0xe0] sm:$0xff]  ;;  %v109_v5 = vld [vmem:[#allocation8 + $0xd8] sm:$0xff] }
  0x36   :  { %204 = vmatprep.subr.mxu1 %v113_v1  ;;  %v108_v6 = vld [vmem:[#allocation8 + $0xd0] sm:$0xff]  ;;  %v107_v7 = vld [vmem:[#allocation8 + $0xc8] sm:$0xff]  ;;  %v106_v8 = vld [vmem:[#allocation8 + $0xc0] sm:$0xff]  ;;  %v284_v42 = vshrl.u32 %v283_v41, 7 }
  0x37   :  { %205 = vmatpush1.msra.mxu1 %v112_v2  ;;  %v105_v9 = vld [vmem:[#allocation8 + $0xb8] sm:$0xff]  ;;  %v104_v10 = vld [vmem:[#allocation8 + $0xb0] sm:$0xff]  ;;  %v103_v11 = vld [vmem:[#allocation8 + $0xa8] sm:$0xff] }
  0x38   :  { %206 = vmatprep.subr.mxu1 %v111_v3  ;;  %v119_v12 = vld [vmem:[#allocation9 + $0x18] sm:$0xff]  ;;  %v102_v13 = vld [vmem:[#allocation8 + $0xa0] sm:$0xff]  ;;  %v118_v14 = vld [vmem:[#allocation9 + $0x10] sm:$0xff]  ;;  %v285_v44 = vsub.s32 0, %v284_v42  ;;  %v289_v46 = vsub.s32 1, %v284_v42 }
  0x39   :  { %207 = vmatpush1.msra.mxu1 %v110_v4  ;;  %155 = vmatprep.subr.mxu0 %v119_v12  ;;  %v101_v15 = vld [vmem:[#allocation8 + $0x98] sm:$0xff]  ;;  %v117_v16 = vld [vmem:[#allocation9 + $0x8] sm:$0xff]  ;;  %v116_v17 = vld [vmem:[#allocation9] sm:$0xff] }
  0x3a   :  { %208 = vmatprep.subr.mxu1 %v109_v5  ;;  %156 = vmatpush1.msra.mxu0 %v118_v14  ;;  %v100_v18 = vld [vmem:[#allocation8 + $0x90] sm:$0xff]  ;;  %v99_v20 = vld [vmem:[#allocation8 + $0x88] sm:$0xff]  ;;  %v98_v21 = vld [vmem:[#allocation8 + $0x80] sm:$0xff] }
  0x3b   :  { %209 = vmatpush1.msra.mxu1 %v108_v6  ;;  %157 = vmatprep.subr.mxu0 %v117_v16  ;;  %v114_v19 = vld [vmem:[#allocation6] sm:$0xff]  ;;  %v97_v22 = vld [vmem:[#allocation8 + $0x78] sm:$0xff]  ;;  %v95_v25 = vld [vmem:[#allocation8 + $0x68] sm:$0xff] }
  0x3c   :  { %210 = vmatprep.subr.mxu1 %v107_v7  ;;  %158 = vmatpush1.msra.mxu0 %v116_v17  ;;  %v115_v23 = vld [vmem:[#allocation6 + $0x8] sm:$0xff]  ;;  %v96_v24 = vld [vmem:[#allocation8 + $0x70] sm:$0xff]  ;;  %v94_v26 = vld [vmem:[#allocation8 + $0x60] sm:$0xff] }
  0x3d   :  { %211 = vmatpush1.msra.mxu1 %v106_v8  ;;  %334 = vmatmul.mubr.msk.f32.vlgmr.msra.gmra.mxu0 %vm120_vm0, %v114_v19  ;;  %v93_v27 = vld [vmem:[#allocation8 + $0x58] sm:$0xff]  ;;  %v92_v28 = vld [vmem:[#allocation8 + $0x50] sm:$0xff]  ;;  %v91_v29 = vld [vmem:[#allocation8 + $0x48] sm:$0xff] }
  0x3e   :  { %212 = vmatprep.subr.mxu1 %v105_v9  ;;  %197 = vmatprep.mubr.f32.mxu0 %v462_v0  ;;  %v90_v30 = vld [vmem:[#allocation8 + $0x40] sm:$0xff]  ;;  %v89_v31 = vld [vmem:[#allocation8 + $0x38] sm:$0xff]  ;;  %v88_v32 = vld [vmem:[#allocation8 + $0x30] sm:$0xff] }
  0x3f   :  { %213 = vmatpush1.msra.mxu1 %v104_v10  ;;  %v87_v33 = vld [vmem:[#allocation8 + $0x28] sm:$0xff]  ;;  %v86_v34 = vld [vmem:[#allocation8 + $0x20] sm:$0xff]  ;;  %v85_v35 = vld [vmem:[#allocation8 + $0x18] sm:$0xff] }
  0x40   :  { %214 = vmatprep.subr.mxu1 %v103_v11  ;;  %v84_v36 = vld [vmem:[#allocation8 + $0x10] sm:$0xff]  ;;  %v83_v37 = vld [vmem:[#allocation8 + $0x8] sm:$0xff]  ;;  %v82_v38 = vld [vmem:[#allocation8] sm:$0xff] }
  0x41   :  { %215 = vmatpush1.msra.mxu1 %v102_v13  ;;  %335 = vmatmul.mubr.msk.f32.gmra.mxu0 %vm120_vm0, %v115_v23  ;;  %v80_v39 = vld [vmem:[#allocation3] sm:$0xff]  ;;  %v81_v40 = vld [vmem:[#allocation3 + $0x8] sm:$0xff] }
  0x42   :  { %216 = vmatprep.subr.mxu1 %v101_v15  ;;  %v281_v45 = vld [vmem:[%s539_s4] sm:$0x3]  ;;  %s463_s4 = smov [#allocation11]  }
  0x43   :  { %217 = vmatpush1.msra.mxu1 %v100_v18  ;;  %v286_v48 = vrot.slane %v281_v45, %v285_v44  ;;  %v290_v51 = vrot.slane %v281_v45, %v289_v46  ;;  %s320_s5 = sshll.u32 %s463_s4, 4  ;;  %s321_s5 = int_to_ptr.vmem [resolvable:$true] %s320_s5 }
  0x44   :  { %218 = vmatprep.subr.mxu1 %v99_v20  ;;  %s426_s21 = scalar_lea.vmem %s321_s5, 512  ;;  %p431_p7 = scmp.lt.s32.totalorder %s321_s5, %s321_s5 }
  0x45   :  { %219 = vmatpush1.msra.mxu1 %v98_v21  ;;  %p427_p6 = scmp.ne.s32.totalorder %s321_s5, %s426_s21  ;;  %p432_p8 = scmp.lt.s32.totalorder %s426_s21, %s426_s21 }
  0x46   :  { %220 = vmatprep.subr.mxu1 %v97_v22 }
  0x47   :  { %221 = vmatpush1.msra.mxu1 %v96_v24  ;;  %p433_p9 = por %p432_p8, %p431_p7 }
  0x48   :  { %222 = vmatprep.subr.mxu1 %v95_v25 }
  0x49   :  { %223 = vmatpush1.msra.mxu1 %v94_v26  ;;  %p434_p10 = pnand %p433_p9, %p427_p6 }
  0x4a   :  { %224 = vmatprep.subr.mxu1 %v93_v27 }
  0x4b   :  { %225 = vmatpush1.msra.mxu1 %v92_v28 }
  0x4c   :  { %226 = vmatprep.subr.mxu1 %v91_v29 }
  0x4d   :  { %227 = vmatpush1.msra.mxu1 %v90_v30 }
  0x4e   :  { %228 = vmatprep.subr.mxu1 %v89_v31 }
  0x4f   :  { %229 = vmatpush1.msra.mxu1 %v88_v32 }
  0x50   :  { %230 = vmatprep.subr.mxu1 %v87_v33 }
  0x51   :  { %231 = vmatpush1.msra.mxu1 %v86_v34 }
  0x52   :  { %232 = vmatprep.subr.mxu1 %v85_v35 }
  0x53   :  { %233 = vmatpush1.msra.mxu1 %v84_v36 }
  0x54   :  { %234 = vmatprep.subr.mxu1 %v83_v37 }
  0x55   :  { %235 = vmatpush1.msra.mxu1 %v82_v38 }
  0x56   :  { %269 = vmatmul.mubr.f32.vlgmr.msra.gmra.mxu1 %v80_v39 }
  0x57   :  { %274 = vmatprep.mubr.f32.mxu1 %v462_v0 }
  0x5a   :  { %275 = vmatmul.mubr.f32.gmra.mxu1 %v81_v40 }
  0xfd   :  { %v193_v43 = vpop.f32.mrf.mxu0 }
  0xff   :  { %v195_v47 = vpop.f32.mrf.mxu0 }
 0x101   :  { %v199_v55 = vpop.f32.mrf.mxu0 }
 0x103   :  { %v201_v0 = vpop.f32.mrf.mxu0 }
 0x116   :  { %v270_v49 = vpop.f32.mrf.mxu1 }
 0x117   :  { %v271_v50 = vadd.f32 %v270_v49, %v193_v43 }
 0x118   :  { %v272_v53 = vpop.f32.mrf.mxu1 }
 0x119   :  { %v293_v54 = vadd.f32 %v286_v48, %v271_v50  ;;  %v273_v56 = vadd.f32 %v272_v53, %v195_v47 }
 0x11a   :  { %v276_v57 = vpop.f32.mrf.mxu1 }
 0x11b   :  { %vm298_vm1 = vcmp.gt.f32.partialorder %v293_v54, 0.0  ;;  %v303_v58 = vmul.f32 %v302_v52, %v293_v54  ;;  %v294_v59 = vadd.f32 %v290_v51, %v273_v56  ;;  %v277_v60 = vadd.f32 %v276_v57, %v199_v55 }
 0x11c   :  { %v278_v61 = vpop.f32.mrf.mxu1 }
 0x11d   :  { %v307_v62 = vsel %vm298_vm1, %v293_v54, %v303_v58  ;;  %vm299_vm2 = vcmp.gt.f32.partialorder %v294_v59, 0.0  ;;  %v304_v63 = vmul.f32 %v302_v52, %v294_v59  ;;  %v295_v1 = vadd.f32 %v286_v48, %v277_v60 }
 0x11e   :  { %311 = vst [vmem:[#allocation11] sm:$0xff] %v307_v62  ;;  %v279_v2 = vadd.f32 %v278_v61, %v201_v0 }
 0x11f   :  { %v308_v3 = vsel %vm299_vm2, %v294_v59, %v304_v63  ;;  %vm300_vm3 = vcmp.gt.f32.partialorder %v295_v1, 0.0  ;;  %v305_v4 = vmul.f32 %v302_v52, %v295_v1 }
 0x120   :  { %312 = vst [vmem:[#allocation11 + $0x8] sm:$0xff] %v308_v3  ;;  %v296_v5 = vadd.f32 %v290_v51, %v279_v2 }
 0x121   :  { %v309_v6 = vsel %vm300_vm3, %v295_v1, %v305_v4 }
 0x122   :  { %313 = vst [vmem:[#allocation11 + $0x10] sm:$0xff] %v309_v6  ;;  %vm301_vm4 = vcmp.gt.f32.partialorder %v296_v5, 0.0  ;;  %v306_v7 = vmul.f32 %v302_v52, %v296_v5 }
 0x124   :  { %v310_v8 = vsel %vm301_vm4, %v296_v5, %v306_v7 }
 0x125   :  { %314 = vst [vmem:[#allocation11 + $0x18] sm:$0xff] %v310_v8 }
 0x126   :  { %437 = shalt.err (!%p434_p10)
}
 0x127   :  { %326 = dma.vmem_to_hbm [thread:$0]  %s321_s5, 512, %s541_s6, [#allocation5], %s459_s1, %s459_s1, %s460_s12  }
 0x128   :  { %452 = dma.done.wait [#allocation5], 512  }
 0x129   :  { %453 = vsyncadd [#allocation5], 4294966784 }
 0x12a   :  { %330 = vsyncpa [#allocation4], 1 }
 0x12b   :  { %331 = vsyncpa [#allocation7], 1 }
 0x12c   :  { %332 = vsyncpa [#allocation10], 1 }
 0x12d   :  { %333 = vsyncpa [#allocation5], 1 }

</bundles_post_ra>
